<compile_context>
chip_gen: v6e
topology: v6e:2x2x1
jax: 0.10.0
libtpu: 0.0.40
codegen_flags: <defaults>
</compile_context>

<pallas_src>
import jax
import jax.numpy as jnp
from jax.experimental import pallas as pl
from jax.experimental.pallas import tpu as pltpu

LANE = 128


def _round_up(n, m=LANE):
    return ((n + m - 1) // m) * m


def _bn_relu(h, gamma, beta, eps=1e-5):
    """Fused BatchNorm1d (training mode, biased variance) + ReLU.

    Two-pass statistics (mean, then E[(h-mean)^2]) for numerical robustness;
    gamma*rsqrt folded into a single per-feature scale, beta as the shift.
    """
    inv_n = 1.0 / h.shape[0]
    mean = jnp.sum(h, axis=0, keepdims=True) * inv_n
    centered = h - mean
    var = jnp.sum(centered * centered, axis=0, keepdims=True) * inv_n
    scale = gamma * jax.lax.rsqrt(var + eps)
    return jnp.maximum(centered * scale + beta, 0.0)


def mlp_kernel(x_ref,
               w1_ref, b1_ref, g1_ref, be1_ref,
               w2_ref, b2_ref, g2_ref, be2_ref,
               w3_ref, b3_ref,
               o_ref):
    # x / weights are bf16 (MXU-friendly); accumulation + elementwise are f32.
    x = x_ref[...]

    # layer_1 -> BN -> ReLU
    h1 = jnp.dot(x, w1_ref[...], preferred_element_type=jnp.float32) + b1_ref[...]
    h1 = _bn_relu(h1, g1_ref[...], be1_ref[...])

    # layer_2 -> BN -> ReLU
    h2 = jnp.dot(h1.astype(jnp.bfloat16), w2_ref[...],
                 preferred_element_type=jnp.float32) + b2_ref[...]
    h2 = _bn_relu(h2, g2_ref[...], be2_ref[...])

    # output -> Sigmoid (0.5*tanh(0.5*x)+0.5: one EUP transcendental per elem)
    logits = jnp.dot(h2.astype(jnp.bfloat16), w3_ref[...],
                     preferred_element_type=jnp.float32) + b3_ref[...]
    o_ref[...] = (0.5 * jnp.tanh(0.5 * logits) + 0.5).astype(o_ref.dtype)


def _prepare_params(params):
    """One-time padding (feature dims -> multiples of 128) + bf16 cast.

    Padded weight rows/cols and biases are zero (gamma padded with 1.0) so
    padded features stay exactly 0 through BN/ReLU and never perturb the
    real columns.  d_in is NOT padded: x/w1 use full-array specs.
    """
    (w1, b1, g1, be1, w2, b2, g2, be2, w3, b3) = params
    d_in, h5 = w1.shape
    h3, d_out = w2.shape[1], w3.shape[1]
    h5_p, h3_p, d_out_p = _round_up(h5), _round_up(h3), _round_up(d_out)

    def pad2(a, rows, cols, fill=0.0):
        return jnp.pad(a, ((0, rows - a.shape[0]), (0, cols - a.shape[1])),
                       constant_values=fill)

    w1p = pad2(w1, d_in, h5_p).astype(jnp.bfloat16)
    w2p = pad2(w2, h5_p, h3_p).astype(jnp.bfloat16)
    w3p = pad2(w3, h3_p, d_out_p).astype(jnp.bfloat16)
    b1p, g1p, be1p = pad2(b1, 1, h5_p), pad2(g1, 1, h5_p, 1.0), pad2(be1, 1, h5_p)
    b2p, g2p, be2p = pad2(b2, 1, h3_p), pad2(g2, 1, h3_p, 1.0), pad2(be2, 1, h3_p)
    b3p = pad2(b3, 1, d_out_p)

    prepared = (w1p, b1p, g1p, be1p, w2p, b2p, g2p, be2p, w3p, b3p)
    dims = dict(d_in=d_in, h5_p=h5_p, h3_p=h3_p, d_out=d_out, d_out_p=d_out_p)
    return prepared, dims


def make_mlp_forward(params):
    """Pad/cast weights ONCE, return a jitted forward(x) closure."""
    prepared, dims = _prepare_params(params)
    # Materialize the prepared constants now (outside the per-call path).
    prepared = tuple(jax.block_until_ready(p) for p in prepared)

    d_in, h5_p, h3_p = dims["d_in"], dims["h5_p"], dims["h3_p"]
    d_out, d_out_p = dims["d_out"], dims["d_out_p"]
    vmem_spec = pl.BlockSpec(memory_space=pltpu.MemorySpace.VMEM)
    param_bytes = sum(int(a.size) * a.dtype.itemsize for a in prepared)

    @jax.jit
    def forward(x):
        batch = x.shape[0]
        xb = x.astype(jnp.bfloat16)      # fuses under jit with the custom call

        flops = 2 * batch * (d_in * h5_p + h5_p * h3_p + h3_p * d_out_p)
        transcendentals = batch * d_out_p + 2 * (h5_p + h3_p)   # tanh + rsqrt
        bytes_accessed = (int(xb.size) * 2 + param_bytes
                          + batch * d_out_p * 4)

        out_padded = pl.pallas_call(
            mlp_kernel,
            out_shape=jax.ShapeDtypeStruct((batch, d_out_p), jnp.float32),
            in_specs=[vmem_spec] * (1 + len(prepared)),
            out_specs=vmem_spec,
            cost_estimate=pl.CostEstimate(flops=flops,
                                          transcendentals=transcendentals,
                                          bytes_accessed=bytes_accessed),
            compiler_params=pltpu.CompilerParams(
                vmem_limit_bytes=4 * 1024 * 1024),
        )(xb, *prepared)

        # Strip lane padding (fuses under jit; in-kernel store stays dense).
        return out_padded[:, :d_out]

    return forward


def mlp_reference(x, params, eps=1e-5):
    """Pure-JAX f32 reference (PyTorch train-mode semantics)."""
    (w1, b1, g1, be1, w2, b2, g2, be2, w3, b3) = params

    def bn(h, g, b):
        m = jnp.mean(h, axis=0, keepdims=True)
        v = jnp.mean((h - m) ** 2, axis=0, keepdims=True)
        return (h - m) / jnp.sqrt(v + eps) * g + b

    h = jnp.maximum(bn(x @ w1 + b1, g1, be1), 0.0)
    h = jnp.maximum(bn(h @ w2 + b2, g2, be2), 0.0)
    return jax.nn.sigmoid(h @ w3 + b3)


def init_params(key, input_size, hidden_size, output_size):
    """Deterministic synthetic init (PyTorch Linear-style uniform fan-in bound)."""
    def linear(key, fan_in, fan_out):
        k_w, k_b = jax.random.split(key)
        bound = 1.0 / jnp.sqrt(fan_in)
        w = jax.random.uniform(k_w, (fan_in, fan_out), jnp.float32, -bound, bound)
        b = jax.random.uniform(k_b, (1, fan_out), jnp.float32, -bound, bound)
        return w, b  # stored transposed: (in, out)

    h5 = hidden_size * 5
    h3 = hidden_size * 3
    k1, k2, k3, k4, k5 = jax.random.split(key, 5)

    w1, b1 = linear(k1, input_size, h5)
    w2, b2 = linear(k2, h5, h3)
    w3, b3 = linear(k3, h3, output_size)

    g1 = jnp.ones((1, h5), jnp.float32) + 0.01 * jax.random.normal(k4, (1, h5))
    be1 = jnp.zeros((1, h5), jnp.float32)
    g2 = jnp.ones((1, h3), jnp.float32) + 0.01 * jax.random.normal(k5, (1, h3))
    be2 = jnp.zeros((1, h3), jnp.float32)

    return (w1, b1, g1, be1, w2, b2, g2, be2, w3, b3)


if __name__ == "__main__":
    # TODO(synk): PyTorch BatchNorm1d(train) also updates running_mean/var as a
    # side effect; this kernel computes only the normalized forward.
    input_size, hidden_size, output_size = 16, 32, 2
    batch = 128  # full MXU row block; whole batch resident for BN statistics

    key = jax.random.PRNGKey(0)
    k_x, k_p = jax.random.split(key)
    x = jax.random.normal(k_x, (batch, input_size), jnp.float32)
    params = init_params(k_p, input_size, hidden_size, output_size)

    forward = make_mlp_forward(params)   # one-time pad/cast of weights
    out = forward(x)
    jax.block_until_ready(out)

    ref = mlp_reference(x, params)
    assert out.shape == (batch, output_size)
    assert bool(jnp.all((out >= 0.0) & (out <= 1.0)))
    max_err = float(jnp.max(jnp.abs(out - ref)))
    assert max_err < 5e-2, f"max abs err vs f32 reference: {max_err}"
    print("KERNEL_OK")
</pallas_src>

<mosaic_0001>
module attributes {stable_mosaic.version = 11 : i64} {
  func.func @mlp_kernel(%arg0: memref<128x16xbf16, #tpu.memory_space<vmem>>, %arg1: memref<16x256xbf16, #tpu.memory_space<vmem>>, %arg2: memref<1x256xf32, #tpu.memory_space<vmem>>, %arg3: memref<1x256xf32, #tpu.memory_space<vmem>>, %arg4: memref<1x256xf32, #tpu.memory_space<vmem>>, %arg5: memref<256x128xbf16, #tpu.memory_space<vmem>>, %arg6: memref<1x128xf32, #tpu.memory_space<vmem>>, %arg7: memref<1x128xf32, #tpu.memory_space<vmem>>, %arg8: memref<1x128xf32, #tpu.memory_space<vmem>>, %arg9: memref<128x128xbf16, #tpu.memory_space<vmem>>, %arg10: memref<1x128xf32, #tpu.memory_space<vmem>>, %arg11: memref<128x128xf32, #tpu.memory_space<vmem>>) attributes {dimension_semantics = [], scalar_prefetch = 0 : i64, scratch_operands = 0 : i64, tpu.core_type = #tpu.core_type<tc>} {
    %c0 = arith.constant 0 : index
    %c0_0 = arith.constant 0 : index
    %0 = vector.load %arg0[%c0, %c0_0] : memref<128x16xbf16, #tpu.memory_space<vmem>>, vector<128x16xbf16>
    %c0_1 = arith.constant 0 : index
    %c0_2 = arith.constant 0 : index
    %1 = vector.load %arg1[%c0_1, %c0_2] : memref<16x256xbf16, #tpu.memory_space<vmem>>, vector<16x256xbf16>
    %cst = arith.constant dense<0.000000e+00> : vector<128x256xf32>
    %2 = tpu.matmul %0, %1, %cst {dimension_numbers = #tpu.dot_dimension_numbers<[1], [0], [0], [1], [0, 0, 1, 1], [], []>} : vector<128x16xbf16>, vector<16x256xbf16>, vector<128x256xf32> -> vector<128x256xf32>
    %c0_3 = arith.constant 0 : index
    %c0_4 = arith.constant 0 : index
    %3 = vector.load %arg2[%c0_3, %c0_4] : memref<1x256xf32, #tpu.memory_space<vmem>>, vector<1x256xf32>
    %4 = vector.broadcast %3 : vector<1x256xf32> to vector<128x256xf32>
    %5 = arith.addf %2, %4 : vector<128x256xf32>
    %c0_5 = arith.constant 0 : index
    %c0_6 = arith.constant 0 : index
    %6 = vector.load %arg3[%c0_5, %c0_6] : memref<1x256xf32, #tpu.memory_space<vmem>>, vector<1x256xf32>
    %c0_7 = arith.constant 0 : index
    %c0_8 = arith.constant 0 : index
    %7 = vector.load %arg4[%c0_7, %c0_8] : memref<1x256xf32, #tpu.memory_space<vmem>>, vector<1x256xf32>
    %cst_9 = arith.constant dense<0.000000e+00> : vector<256xf32>
    %8 = vector.multi_reduction <add>, %5, %cst_9 [0] : vector<128x256xf32> to vector<256xf32>
    %9 = vector.shape_cast %8 : vector<256xf32> to vector<1x256xf32>
    %cst_10 = arith.constant 7.812500e-03 : f32
    %10 = vector.broadcast %cst_10 : f32 to vector<1x256xf32>
    %11 = arith.mulf %9, %10 : vector<1x256xf32>
    %12 = vector.broadcast %11 : vector<1x256xf32> to vector<128x256xf32>
    %13 = arith.subf %5, %12 : vector<128x256xf32>
    %14 = arith.mulf %13, %13 : vector<128x256xf32>
    %cst_11 = arith.constant dense<0.000000e+00> : vector<256xf32>
    %15 = vector.multi_reduction <add>, %14, %cst_11 [0] : vector<128x256xf32> to vector<256xf32>
    %16 = vector.shape_cast %15 : vector<256xf32> to vector<1x256xf32>
    %cst_12 = arith.constant 7.812500e-03 : f32
    %17 = vector.broadcast %cst_12 : f32 to vector<1x256xf32>
    %18 = arith.mulf %16, %17 : vector<1x256xf32>
    %cst_13 = arith.constant 9.99999974E-6 : f32
    %19 = vector.broadcast %cst_13 : f32 to vector<1x256xf32>
    %20 = arith.addf %18, %19 : vector<1x256xf32>
    %21 = math.rsqrt %20 : vector<1x256xf32>
    %22 = arith.mulf %6, %21 : vector<1x256xf32>
    %23 = vector.broadcast %22 : vector<1x256xf32> to vector<128x256xf32>
    %24 = arith.mulf %13, %23 : vector<128x256xf32>
    %25 = vector.broadcast %7 : vector<1x256xf32> to vector<128x256xf32>
    %26 = arith.addf %24, %25 : vector<128x256xf32>
    %cst_14 = arith.constant 0.000000e+00 : f32
    %27 = vector.broadcast %cst_14 : f32 to vector<128x256xf32>
    %28 = arith.maximumf %26, %27 : vector<128x256xf32>
    %29 = arith.truncf %28 : vector<128x256xf32> to vector<128x256xbf16>
    %c0_15 = arith.constant 0 : index
    %c0_16 = arith.constant 0 : index
    %30 = vector.load %arg5[%c0_15, %c0_16] : memref<256x128xbf16, #tpu.memory_space<vmem>>, vector<256x128xbf16>
    %cst_17 = arith.constant dense<0.000000e+00> : vector<128x128xf32>
    %31 = tpu.matmul %29, %30, %cst_17 {dimension_numbers = #tpu.dot_dimension_numbers<[1], [0], [0], [1], [0, 0, 1, 1], [], []>} : vector<128x256xbf16>, vector<256x128xbf16>, vector<128x128xf32> -> vector<128x128xf32>
    %c0_18 = arith.constant 0 : index
    %c0_19 = arith.constant 0 : index
    %32 = vector.load %arg6[%c0_18, %c0_19] : memref<1x128xf32, #tpu.memory_space<vmem>>, vector<1x128xf32>
    %33 = vector.broadcast %32 : vector<1x128xf32> to vector<128x128xf32>
    %34 = arith.addf %31, %33 : vector<128x128xf32>
    %c0_20 = arith.constant 0 : index
    %c0_21 = arith.constant 0 : index
    %35 = vector.load %arg7[%c0_20, %c0_21] : memref<1x128xf32, #tpu.memory_space<vmem>>, vector<1x128xf32>
    %c0_22 = arith.constant 0 : index
    %c0_23 = arith.constant 0 : index
    %36 = vector.load %arg8[%c0_22, %c0_23] : memref<1x128xf32, #tpu.memory_space<vmem>>, vector<1x128xf32>
    %cst_24 = arith.constant dense<0.000000e+00> : vector<128xf32>
    %37 = vector.multi_reduction <add>, %34, %cst_24 [0] : vector<128x128xf32> to vector<128xf32>
    %38 = vector.shape_cast %37 : vector<128xf32> to vector<1x128xf32>
    %cst_25 = arith.constant 7.812500e-03 : f32
    %39 = vector.broadcast %cst_25 : f32 to vector<1x128xf32>
    %40 = arith.mulf %38, %39 : vector<1x128xf32>
    %41 = vector.broadcast %40 : vector<1x128xf32> to vector<128x128xf32>
    %42 = arith.subf %34, %41 : vector<128x128xf32>
    %43 = arith.mulf %42, %42 : vector<128x128xf32>
    %cst_26 = arith.constant dense<0.000000e+00> : vector<128xf32>
    %44 = vector.multi_reduction <add>, %43, %cst_26 [0] : vector<128x128xf32> to vector<128xf32>
    %45 = vector.shape_cast %44 : vector<128xf32> to vector<1x128xf32>
    %cst_27 = arith.constant 7.812500e-03 : f32
    %46 = vector.broadcast %cst_27 : f32 to vector<1x128xf32>
    %47 = arith.mulf %45, %46 : vector<1x128xf32>
    %cst_28 = arith.constant 9.99999974E-6 : f32
    %48 = vector.broadcast %cst_28 : f32 to vector<1x128xf32>
    %49 = arith.addf %47, %48 : vector<1x128xf32>
    %50 = math.rsqrt %49 : vector<1x128xf32>
    %51 = arith.mulf %35, %50 : vector<1x128xf32>
    %52 = vector.broadcast %51 : vector<1x128xf32> to vector<128x128xf32>
    %53 = arith.mulf %42, %52 : vector<128x128xf32>
    %54 = vector.broadcast %36 : vector<1x128xf32> to vector<128x128xf32>
    %55 = arith.addf %53, %54 : vector<128x128xf32>
    %cst_29 = arith.constant 0.000000e+00 : f32
    %56 = vector.broadcast %cst_29 : f32 to vector<128x128xf32>
    %57 = arith.maximumf %55, %56 : vector<128x128xf32>
    %58 = arith.truncf %57 : vector<128x128xf32> to vector<128x128xbf16>
    %c0_30 = arith.constant 0 : index
    %c0_31 = arith.constant 0 : index
    %59 = vector.load %arg9[%c0_30, %c0_31] : memref<128x128xbf16, #tpu.memory_space<vmem>>, vector<128x128xbf16>
    %cst_32 = arith.constant dense<0.000000e+00> : vector<128x128xf32>
    %60 = tpu.matmul %58, %59, %cst_32 {dimension_numbers = #tpu.dot_dimension_numbers<[1], [0], [0], [1], [0, 0, 1, 1], [], []>} : vector<128x128xbf16>, vector<128x128xbf16>, vector<128x128xf32> -> vector<128x128xf32>
    %c0_33 = arith.constant 0 : index
    %c0_34 = arith.constant 0 : index
    %61 = vector.load %arg10[%c0_33, %c0_34] : memref<1x128xf32, #tpu.memory_space<vmem>>, vector<1x128xf32>
    %62 = vector.broadcast %61 : vector<1x128xf32> to vector<128x128xf32>
    %63 = arith.addf %60, %62 : vector<128x128xf32>
    %cst_35 = arith.constant 5.000000e-01 : f32
    %64 = vector.broadcast %cst_35 : f32 to vector<128x128xf32>
    %65 = arith.mulf %64, %63 : vector<128x128xf32>
    %66 = math.tanh %65 : vector<128x128xf32>
    %cst_36 = arith.constant 5.000000e-01 : f32
    %67 = vector.broadcast %cst_36 : f32 to vector<128x128xf32>
    %68 = arith.mulf %67, %66 : vector<128x128xf32>
    %cst_37 = arith.constant 5.000000e-01 : f32
    %69 = vector.broadcast %cst_37 : f32 to vector<128x128xf32>
    %70 = arith.addf %68, %69 : vector<128x128xf32>
    %c0_38 = arith.constant 0 : index
    %c0_39 = arith.constant 0 : index
    %71 = vector.load %arg11[%c0_38, %c0_39] : memref<128x128xf32, #tpu.memory_space<vmem>>, vector<128x128xf32>
    tpu.vector_store %arg11[%c0_38, %c0_39], %70 {strides = array<i32>} : memref<128x128xf32, #tpu.memory_space<vmem>>, vector<128x128xf32>,
    return
  }
}

</mosaic_0001>

<bundles_post_ra>
// kernel: forward.1
= control target key start
LH: loop header
LB: loop body
LE: loop exit
PB: predicated region body
PF: predicated region fallthrough
CT: control target
= control target key end

     0   :  { %16 = vsyncpa [#allocation3], 0  ;;  %s1473_s17 = smov [#allocation2]   ;;  %s2219_s0 = inlined_call_operand.vmem [shape: bf16[128,16], index: 0, kind: input, shape index: {}]   ;;  %s2220_s1 = inlined_call_operand.vmem [shape: bf16[16,256], index: 1, kind: input, shape index: {}]   ;;  %s2221_s2 = inlined_call_operand.vmem [shape: f32[1,256], index: 2, kind: input, shape index: {}]   ;;  %s2222_s3 = inlined_call_operand.vmem [shape: f32[1,256], index: 3, kind: input, shape index: {}]   ;;  %s2223_s4 = inlined_call_operand.vmem [shape: f32[1,256], index: 4, kind: input, shape index: {}]   ;;  %s2224_s5 = inlined_call_operand.hbm [shape: bf16[256,128], index: 5, kind: input, shape index: {}]   ;;  %s2225_s6 = inlined_call_operand.vmem [shape: f32[1,128], index: 6, kind: input, shape index: {}]   ;;  %s2226_s7 = inlined_call_operand.vmem [shape: f32[1,128], index: 7, kind: input, shape index: {}]   ;;  %s2227_s8 = inlined_call_operand.vmem [shape: f32[1,128], index: 8, kind: input, shape index: {}]   ;;  %s2228_s9 = inlined_call_operand.vmem [shape: bf16[128,128], index: 9, kind: input, shape index: {}]   ;;  %s2229_s10 = inlined_call_operand.vmem [shape: f32[1,128], index: 10, kind: input, shape index: {}]   ;;  %s2230_s11 = inlined_call_operand.vmem [shape: f32[128,128], index: 11, kind: output, shape index: {}]  }
   0x1   :  { %s32_s18 = sshll.u32 %s1473_s17, 4  ;;  %s33_s18 = int_to_ptr.vmem [resolvable:$true] %s32_s18 }
   0x2   :  { %s1459_s19 = scalar_lea.vmem %s33_s18, 2048  ;;  %p1464_p1 = scmp.lt.s32.totalorder %s33_s18, %s33_s18 }
   0x3   :  { %p1460_p0 = scmp.ne.s32.totalorder %s33_s18, %s1459_s19  ;;  %p1465_p2 = scmp.lt.s32.totalorder %s1459_s19, %s1459_s19 }
   0x5   :  { %p1466_p3 = por %p1465_p2, %p1464_p1 }
   0x7   :  { %p1467_p4 = pnand %p1466_p3, %p1460_p0 }
   0x9   :  { %1470 = shalt.err (!%p1467_p4)
}
   0xa   :  { %s1474_s20 = smov 64   ;;  %s1475_s21 = smov 4  }
   0xb   :  { %38 = dma.hbm_to_vmem [thread:$0]  %s2224_s5, 2048, %s33_s18, [#allocation3], %s1474_s20, %s1474_s20, %s1475_s21  }
   0xc   :  { %1471 = dma.done.wait [#allocation3], 2048  }
   0xd   :  { %1472 = vsyncadd [#allocation3], 4294965248  ;;  %v1476_v0 = vmov 0   ;;  %v1378_v1 = vld [vmem:[%s2220_s1 + $0x4] ss:$8 sps:$4 sm:$0xff]   ;;  %vm133_vm0 = vcmask 130048   ;;  %v73_v20 = vlaneseq }
   0xe   :  { %190 = vmatprep.mubr.bf16.mxu0 %v1476_v0  ;;  %v1380_v2 = vld [vmem:[%s2220_s1] ss:$8 sps:$4 sm:$0xff]   ;;  %172 = vmatprep.subr.bf16.mxu0 %v1378_v1  ;;  %v1383_v5 = vld [vmem:[%s2219_s0 + $0x10] sm:$0xff]   ;;  %v1384_v6 = vld [vmem:[%s2219_s0 + $0x18] sm:$0xff]  }
   0xf   :  { %v1381_v3 = vld [vmem:[%s2219_s0] sm:$0xff]   ;;  %173 = vmatpush1.bf16.msra.mxu0 %v1380_v2  ;;  %v1382_v4 = vld [vmem:[%s2219_s0 + $0x8] sm:$0xff]   ;;  %v1387_v9 = vld [vmem:[%s2219_s0 + $0x30] sm:$0xff]   ;;  %v1579_v25 = vshrl.u32 %v73_v20, 7 }
  0x10   :  { %v1385_v7 = vld [vmem:[%s2219_s0 + $0x20] sm:$0xff]   ;;  %v1386_v8 = vld [vmem:[%s2219_s0 + $0x28] sm:$0xff]   ;;  %v1388_v10 = vld [vmem:[%s2219_s0 + $0x38] sm:$0xff]  }
  0x11   :  { %v1389_v21 = vld [vmem:[#allocation2 + $0x78] sm:$0xff]   ;;  %v1391_v26 = vld [vmem:[#allocation2 + $0x70] sm:$0xff]   ;;  %v1582_v30 = vsub.s32 0, %v1579_v25  ;;  %v1393_v31 = vld [vmem:[#allocation2 + $0x68] sm:$0xff]   ;;  %v1588_v35 = vsub.s32 1, %v1579_v25 }
  0x12   :  { %1226 = vmatmul.mubr.msk.bf16.vlgmr.msra.gmra.mxu0 %vm133_vm0, %v1381_v3  ;;  %v1390_v23 = vld [vmem:[#allocation2 + $0x38] sm:$0xff]   ;;  %1261 = vmatprep.subr.bf16.mxu1 %v1389_v21  ;;  %v1392_v28 = vld [vmem:[#allocation2 + $0x30] sm:$0xff]   ;;  %v71_v32 = vld [vmem:[%s2221_s2] sm:$0x3] }
  0x13   :  { %200 = vmatprep.mubr.bf16.mxu0 %v1476_v0  ;;  %1262 = vmatpush3.bf16.msra.mxu1 %v1390_v23  ;;  %v1394_v34 = vld [vmem:[#allocation2 + $0x28] sm:$0xff]   ;;  %v1591_v37 = vrot.slane %v71_v32, %v1582_v30  ;;  %v1395_v38 = vld [vmem:[#allocation2 + $0x60] sm:$0xff]   ;;  %v1594_v41 = vrot.slane %v71_v32, %v1588_v35  ;;  %v1397_v47 = vld [vmem:[#allocation2 + $0x58] sm:$0xff]  }
  0x14   :  { %1263 = vmatprep.subr.bf16.mxu1 %v1391_v26  ;;  %v1396_v40 = vld [vmem:[#allocation2 + $0x20] sm:$0xff]   ;;  %v1398_v49 = vld [vmem:[#allocation2 + $0x18] sm:$0xff]   ;;  %v1399_v59 = vld [vmem:[#allocation2 + $0x50] sm:$0xff]  }
  0x15   :  { %v1400_v61 = vld [vmem:[#allocation2 + $0x10] sm:$0xff]   ;;  %v1401_v3 = vld [vmem:[#allocation2 + $0x48] sm:$0xff]  }
  0x17   :  { %1264 = vmatpush3.bf16.msra.mxu1 %v1392_v28 }
  0x18   :  { %1265 = vmatprep.subr.bf16.mxu1 %v1393_v31 }
  0x1a   :  { %1227 = vmatmul.mubr.msk.bf16.gmra.mxu0 %vm133_vm0, %v1382_v4  ;;  %v1402_v4 = vld [vmem:[#allocation2 + $0x8] sm:$0xff]  }
  0x1b   :  { %210 = vmatprep.mubr.bf16.mxu0 %v1476_v0  ;;  %1266 = vmatpush3.bf16.msra.mxu1 %v1394_v34 }
  0x1c   :  { %1267 = vmatprep.subr.bf16.mxu1 %v1395_v38 }
  0x1f   :  { %1268 = vmatpush3.bf16.msra.mxu1 %v1396_v40 }
  0x20   :  { %1269 = vmatprep.subr.bf16.mxu1 %v1397_v47 }
  0x22   :  { %1228 = vmatmul.mubr.msk.bf16.gmra.mxu0 %vm133_vm0, %v1383_v5 }
  0x23   :  { %220 = vmatprep.mubr.bf16.mxu0 %v1476_v0  ;;  %1270 = vmatpush3.bf16.msra.mxu1 %v1398_v49 }
  0x24   :  { %1271 = vmatprep.subr.bf16.mxu1 %v1399_v59 }
  0x27   :  { %1272 = vmatpush3.bf16.msra.mxu1 %v1400_v61 }
  0x28   :  { %1273 = vmatprep.subr.bf16.mxu1 %v1401_v3 }
  0x2a   :  { %1229 = vmatmul.mubr.msk.bf16.gmra.mxu0 %vm133_vm0, %v1384_v6 }
  0x2b   :  { %230 = vmatprep.mubr.bf16.mxu0 %v1476_v0  ;;  %1274 = vmatpush3.bf16.msra.mxu1 %v1402_v4 }
  0x32   :  { %1230 = vmatmul.mubr.msk.bf16.gmra.mxu0 %vm133_vm0, %v1385_v7 }
  0x33   :  { %240 = vmatprep.mubr.bf16.mxu0 %v1476_v0 }
  0x3a   :  { %1231 = vmatmul.mubr.msk.bf16.gmra.mxu0 %vm133_vm0, %v1386_v8 }
  0x3b   :  { %250 = vmatprep.mubr.bf16.mxu0 %v1476_v0 }
  0x42   :  { %1232 = vmatmul.mubr.msk.bf16.gmra.mxu0 %vm133_vm0, %v1387_v9  ;;  %v1403_v9 = vld [vmem:[#allocation2 + $0x40] sm:$0xff]  }
  0x43   :  { %260 = vmatprep.mubr.bf16.mxu0 %v1476_v0  ;;  %1275 = vmatprep.subr.bf16.mxu1 %v1403_v9 }
  0x4a   :  { %1233 = vmatmul.mubr.msk.bf16.gmra.mxu0 %vm133_vm0, %v1388_v10 }
  0xd2   :  { %v192_v11 = vpop.f32.mrf.mxu0 }
  0xd3   :  { %v1600_v44 = vadd.f32 %v192_v11, %v1591_v37 }
  0xd4   :  { %v194_v12 = vpop.f32.mrf.mxu0 }
  0xd5   :  { %v1609_v50 = vadd.f32 %v194_v12, %v1594_v41 }
  0xd6   :  { %v196_v13 = vpop.f32.mrf.mxu0 }
  0xd7   :  { %v1597_v42 = vadd.f32 %v196_v13, %v1591_v37 }
  0xd8   :  { %v198_v14 = vpop.f32.mrf.mxu0 }
  0xd9   :  { %v1603_v45 = vadd.f32 %v198_v14, %v1594_v41  ;;  %v273_v51 = vadd.f32 %v1597_v42, %v1600_v44 }
  0xda   :  { %v202_v15 = vpop.f32.mrf.mxu0 }
  0xdb   :  { %v1606_v46 = vadd.f32 %v202_v15, %v1591_v37  ;;  %v294_v55 = vadd.f32 %v1603_v45, %v1609_v50 }
  0xdc   :  { %v204_v16 = vpop.f32.mrf.mxu0 }
  0xdd   :  { %v1614_v52 = vadd.f32 %v204_v16, %v1594_v41  ;;  %v274_v56 = vadd.f32 %v273_v51, %v1606_v46  ;;  %v1404_v16 = vld [vmem:[#allocation2] sm:$0xff]  }
  0xde   :  { %v206_v17 = vpop.f32.mrf.mxu0  ;;  %1276 = vmatpush3.bf16.msra.mxu1 %v1404_v16 }
  0xdf   :  { %v1617_v53 = vadd.f32 %v206_v17, %v1591_v37  ;;  %v295_v62 = vadd.f32 %v294_v55, %v1614_v52 }
  0xe0   :  { %v208_v18 = vpop.f32.mrf.mxu0 }
  0xe1   :  { %v1623_v57 = vadd.f32 %v208_v18, %v1594_v41  ;;  %v275_v63 = vadd.f32 %v274_v56, %v1617_v53 }
  0xe2   :  { %v212_v19 = vpop.f32.mrf.mxu0 }
  0xe3   :  { %v1626_v58 = vadd.f32 %v212_v19, %v1591_v37  ;;  %v296_v5 = vadd.f32 %v295_v62, %v1623_v57 }
  0xe4   :  { %v214_v22 = vpop.f32.mrf.mxu0 }
  0xe5   :  { %v1631_v0 = vadd.f32 %v214_v22, %v1594_v41  ;;  %v276_v6 = vadd.f32 %v275_v63, %v1626_v58 }
  0xe6   :  { %v216_v24 = vpop.f32.mrf.mxu0 }
  0xe7   :  { %v1634_v1 = vadd.f32 %v216_v24, %v1591_v37  ;;  %v297_v11 = vadd.f32 %v296_v5, %v1631_v0 }
  0xe8   :  { %v218_v27 = vpop.f32.mrf.mxu0 }
  0xe9   :  { %v1639_v7 = vadd.f32 %v218_v27, %v1594_v41  ;;  %v277_v12 = vadd.f32 %v276_v6, %v1634_v1 }
  0xea   :  { %v222_v29 = vpop.f32.mrf.mxu0 }
  0xeb   :  { %v1642_v8 = vadd.f32 %v222_v29, %v1591_v37  ;;  %v298_v17 = vadd.f32 %v297_v11, %v1639_v7 }
  0xec   :  { %v224_v33 = vpop.f32.mrf.mxu0 }
  0xed   :  { %v1647_v13 = vadd.f32 %v224_v33, %v1594_v41  ;;  %v278_v18 = vadd.f32 %v277_v12, %v1642_v8 }
  0xee   :  { %v226_v36 = vpop.f32.mrf.mxu0 }
  0xef   :  { %v1650_v14 = vadd.f32 %v226_v36, %v1591_v37  ;;  %v299_v22 = vadd.f32 %v298_v17, %v1647_v13 }
  0xf0   :  { %v228_v39 = vpop.f32.mrf.mxu0 }
  0xf1   :  { %v1655_v19 = vadd.f32 %v228_v39, %v1594_v41  ;;  %v279_v23 = vadd.f32 %v278_v18, %v1650_v14 }
  0xf2   :  { %v232_v43 = vpop.f32.mrf.mxu0 }
  0xf3   :  { %v1658_v20 = vadd.f32 %v232_v43, %v1591_v37  ;;  %v300_v28 = vadd.f32 %v299_v22, %v1655_v19 }
  0xf4   :  { %v234_v48 = vpop.f32.mrf.mxu0 }
  0xf5   :  { %v1663_v24 = vadd.f32 %v234_v48, %v1594_v41  ;;  %v280_v29 = vadd.f32 %v279_v23, %v1658_v20 }
  0xf6   :  { %v236_v54 = vpop.f32.mrf.mxu0 }
  0xf7   :  { %v1666_v26 = vadd.f32 %v236_v54, %v1591_v37  ;;  %v301_v34 = vadd.f32 %v300_v28, %v1663_v24 }
  0xf8   :  { %v238_v60 = vpop.f32.mrf.mxu0 }
  0xf9   :  { %v1671_v31 = vadd.f32 %v238_v60, %v1594_v41  ;;  %v281_v36 = vadd.f32 %v280_v29, %v1666_v26 }
  0xfa   :  { %v242_v2 = vpop.f32.mrf.mxu0 }
  0xfb   :  { %v1674_v32 = vadd.f32 %v242_v2, %v1591_v37  ;;  %v302_v43 = vadd.f32 %v301_v34, %v1671_v31 }
  0xfc   :  { %v244_v10 = vpop.f32.mrf.mxu0 }
  0xfd   :  { %v1679_v38 = vadd.f32 %v244_v10, %v1594_v41  ;;  %v282_v47 = vadd.f32 %v281_v36, %v1674_v32 }
  0xfe   :  { %v246_v15 = vpop.f32.mrf.mxu0 }
  0xff   :  { %v1682_v39 = vadd.f32 %v246_v15, %v1591_v37  ;;  %v303_v54 = vadd.f32 %v302_v43, %v1679_v38 }
 0x100   :  { %v248_v21 = vpop.f32.mrf.mxu0 }
 0x101   :  { %v1687_v48 = vadd.f32 %v248_v21, %v1594_v41  ;;  %v283_v55 = vadd.f32 %v282_v47, %v1682_v39 }
 0x102   :  { %v252_v27 = vpop.f32.mrf.mxu0 }
 0x103   :  { %v1690_v49 = vadd.f32 %v252_v27, %v1591_v37  ;;  %v304_v61 = vadd.f32 %v303_v54, %v1687_v48 }
 0x104   :  { %v254_v33 = vpop.f32.mrf.mxu0 }
 0x105   :  { %v1695_v56 = vadd.f32 %v254_v33, %v1594_v41  ;;  %v284_v62 = vadd.f32 %v283_v55, %v1690_v49 }
 0x106   :  { %v256_v40 = vpop.f32.mrf.mxu0 }
 0x107   :  { %v1698_v59 = vadd.f32 %v256_v40, %v1591_v37  ;;  %v305_v4 = vadd.f32 %v304_v61, %v1695_v56 }
 0x108   :  { %v258_v51 = vpop.f32.mrf.mxu0 }
 0x109   :  { %v1703_v63 = vadd.f32 %v258_v51, %v1594_v41  ;;  %v285_v5 = vadd.f32 %v284_v62, %v1698_v59 }
 0x10a   :  { %v262_v60 = vpop.f32.mrf.mxu0 }
 0x10b   :  { %v1706_v2 = vadd.f32 %v262_v60, %v1591_v37  ;;  %v306_v10 = vadd.f32 %v305_v4, %v1703_v63 }
 0x10c   :  { %v264_v3 = vpop.f32.mrf.mxu0 }
 0x10d   :  { %v1711_v6 = vadd.f32 %v264_v3, %v1594_v41  ;;  %v286_v11 = vadd.f32 %v285_v5, %v1706_v2 }
 0x10e   :  { %v266_v9 = vpop.f32.mrf.mxu0 }
 0x10f   :  { %v1716_v12 = vadd.f32 %v266_v9, %v1591_v37  ;;  %v307_v16 = vadd.f32 %v306_v10, %v1711_v6 }
 0x110   :  { %v268_v15 = vpop.f32.mrf.mxu0 }
 0x111   :  { %v287_v17 = vadd.f32 %v286_v11, %v1716_v12  ;;  %v1721_v18 = vadd.f32 %v268_v15, %v1594_v41 }
 0x113   :  { %v288_v21 = vrot.slane %v287_v17, 4  ;;  %v308_v22 = vadd.f32 %v307_v16, %v1721_v18 }
 0x115   :  { %v289_v23 = vadd.f32 %v288_v21, %v287_v17  ;;  %v309_v27 = vrot.slane %v308_v22, 4 }
 0x117   :  { %v290_v28 = vrot.slane %v289_v23, 2  ;;  %v310_v29 = vadd.f32 %v309_v27, %v308_v22 }
 0x119   :  { %v291_v33 = vadd.f32 %v290_v28, %v289_v23  ;;  %v311_v34 = vrot.slane %v310_v29, 2 }
 0x11b   :  { %v292_v36 = vrot.slane %v291_v33, 1  ;;  %v312_v40 = vadd.f32 %v311_v34, %v310_v29 }
 0x11d   :  { %v293_v37 = vadd.f32 %v292_v36, %v291_v33  ;;  %v313_v51 = vrot.slane %v312_v40, 1 }
 0x11f   :  { %v1724_v43 = vmul.f32 0.0078125, %v293_v37  ;;  %v314_v61 = vadd.f32 %v313_v51, %v312_v40 }
 0x121   :  { %v1728_v47 = vsub.f32 %v1600_v44, %v1724_v43  ;;  %v1732_v41 = vsub.f32 %v1597_v42, %v1724_v43  ;;  %v1736_v54 = vsub.f32 %v1606_v46, %v1724_v43  ;;  %v1744_v44 = vsub.f32 %v1617_v53, %v1724_v43 }
 0x122   :  { %v1748_v42 = vsub.f32 %v1626_v58, %v1724_v43  ;;  %v1752_v3 = vmul.f32 0.0078125, %v314_v61  ;;  %v1756_v4 = vsub.f32 %v1634_v1, %v1724_v43  ;;  %v1770_v10 = vsub.f32 %v1642_v8, %v1724_v43 }
 0x123   :  { %v349_v55 = vmul.f32 %v1728_v47, %v1728_v47  ;;  %v351_v60 = vmul.f32 %v1732_v41, %v1732_v41  ;;  %v353_v62 = vmul.f32 %v1736_v54, %v1736_v54  ;;  %v355_v5 = vmul.f32 %v1744_v44, %v1744_v44 }
 0x124   :  { %v1762_v53 = vsub.f32 %v1609_v50, %v1752_v3  ;;  %v1766_v58 = vsub.f32 %v1603_v45, %v1752_v3  ;;  %v357_v1 = vmul.f32 %v1748_v42, %v1748_v42  ;;  %v1776_v15 = vsub.f32 %v1650_v14, %v1724_v43 }
 0x125   :  { %v381_v46 = vadd.f32 %v351_v60, %v349_v55  ;;  %v359_v50 = vmul.f32 %v1756_v4, %v1756_v4  ;;  %v1782_v45 = vsub.f32 %v1614_v52, %v1752_v3  ;;  %v1790_v21 = vsub.f32 %v1658_v20, %v1724_v43 }
 0x126   :  { %v350_v8 = vmul.f32 %v1762_v53, %v1762_v53  ;;  %v352_v17 = vmul.f32 %v1766_v58, %v1766_v58  ;;  %v361_v14 = vmul.f32 %v1770_v10, %v1770_v10  ;;  %v1796_v23 = vsub.f32 %v1623_v57, %v1752_v3 }
 0x127   :  { %v382_v9 = vadd.f32 %v381_v46, %v353_v62  ;;  %v1800_v52 = vsub.f32 %v1666_v26, %v1724_v43  ;;  %v363_v27 = vmul.f32 %v1776_v15, %v1776_v15  ;;  %v1806_v20 = vsub.f32 %v1631_v0, %v1752_v3 }
 0x128   :  { %v354_v29 = vmul.f32 %v1782_v45, %v1782_v45  ;;  %v402_v33 = vadd.f32 %v352_v17, %v350_v8  ;;  %v1812_v57 = vsub.f32 %v1674_v32, %v1724_v43  ;;  %v365_v26 = vmul.f32 %v1790_v21, %v1790_v21 }
 0x129   :  { %v383_v11 = vadd.f32 %v382_v9, %v355_v5  ;;  %v1818_v36 = vsub.f32 %v1639_v7, %v1752_v3  ;;  %v356_v0 = vmul.f32 %v1796_v23, %v1796_v23  ;;  %v1824_v40 = vsub.f32 %v1682_v39, %v1724_v43 }
 0x12a   :  { %v403_v37 = vadd.f32 %v402_v33, %v354_v29  ;;  %v367_v32 = vmul.f32 %v1800_v52, %v1800_v52  ;;  %v1830_v55 = vsub.f32 %v1647_v13, %v1752_v3  ;;  %v358_v7 = vmul.f32 %v1806_v20, %v1806_v20 }
 0x12b   :  { %v384_v16 = vadd.f32 %v383_v11, %v357_v1  ;;  %v1836_v61 = vsub.f32 %v1690_v49, %v1724_v43  ;;  %v369_v39 = vmul.f32 %v1812_v57, %v1812_v57  ;;  %v1842_v46 = vsub.f32 %v1655_v19, %v1752_v3 }
 0x12c   :  { %v404_v60 = vadd.f32 %v403_v37, %v356_v0  ;;  %v360_v13 = vmul.f32 %v1818_v36, %v1818_v36  ;;  %v1848_v9 = vsub.f32 %v1698_v59, %v1724_v43  ;;  %v371_v49 = vmul.f32 %v1824_v40, %v1824_v40 }
 0x12d   :  { %v385_v22 = vadd.f32 %v384_v16, %v359_v50  ;;  %v1854_v11 = vsub.f32 %v1663_v24, %v1752_v3  ;;  %v362_v19 = vmul.f32 %v1830_v55, %v1830_v55  ;;  %v1860_v16 = vsub.f32 %v1706_v2, %v1724_v43 }
 0x12e   :  { %v405_v5 = vadd.f32 %v404_v60, %v358_v7  ;;  %v373_v59 = vmul.f32 %v1836_v61, %v1836_v61  ;;  %v1866_v17 = vsub.f32 %v1671_v31, %v1752_v3  ;;  %v364_v24 = vmul.f32 %v1842_v46, %v1842_v46 }
 0x12f   :  { %v386_v28 = vadd.f32 %v385_v22, %v361_v14  ;;  %v1872_v22 = vsub.f32 %v1716_v12, %v1724_v43  ;;  %v375_v2 = vmul.f32 %v1848_v9, %v1848_v9  ;;  %v366_v31 = vmul.f32 %v1854_v11, %v1854_v11 }
 0x130   :  { %v406_v50 = vadd.f32 %v405_v5, %v360_v13  ;;  %v377_v33 = vmul.f32 %v1860_v16, %v1860_v16  ;;  %v1886_v12 = vsub.f32 %v1687_v48, %v1752_v3  ;;  %v368_v43 = vmul.f32 %v1866_v17, %v1866_v17 }
 0x131   :  { %v387_v34 = vadd.f32 %v386_v28, %v363_v27  ;;  %v1878_v28 = vsub.f32 %v1679_v38, %v1752_v3  ;;  %v379_v38 = vmul.f32 %v1872_v22, %v1872_v22  ;;  %v1894_v37 = vsub.f32 %v1695_v56, %v1752_v3 }
 0x132   :  { %v407_v14 = vadd.f32 %v406_v50, %v362_v19  ;;  %v1900_v48 = vsub.f32 %v1703_v63, %v1752_v3  ;;  %v372_v60 = vmul.f32 %v1886_v12, %v1886_v12  ;;  %v1906_v13 = vsub.f32 %v1711_v6, %v1752_v3 }
 0x133   :  { %v388_v51 = vadd.f32 %v387_v34, %v365_v26  ;;  %v374_v56 = vmul.f32 %v1894_v37, %v1894_v37 }
 0x134   :  { %v408_v29 = vadd.f32 %v407_v14, %v364_v24  ;;  %v376_v63 = vmul.f32 %v1900_v48, %v1900_v48 }
 0x135   :  { %v389_v62 = vadd.f32 %v388_v51, %v367_v32  ;;  %v370_v32 = vmul.f32 %v1878_v28, %v1878_v28 }
 0x136   :  { %v409_v34 = vadd.f32 %v408_v29, %v366_v31 }
 0x137   :  { %v390_v1 = vadd.f32 %v389_v62, %v369_v39 }
 0x138   :  { %v410_v51 = vadd.f32 %v409_v34, %v368_v43 }
 0x139   :  { %v391_v8 = vadd.f32 %v390_v1, %v371_v49  ;;  %v1912_v1 = vsub.f32 %v1721_v18, %v1752_v3 }
 0x13a   :  { %v411_v39 = vadd.f32 %v410_v51, %v370_v32  ;;  %v1477_v51 = vmov 1966171168  }
 0x13b   :  { %v392_v27 = vadd.f32 %v391_v8, %v373_v59  ;;  %v378_v59 = vmul.f32 %v1906_v13, %v1906_v13  ;;  %v380_v24 = vmul.f32 %v1912_v1, %v1912_v1 }
 0x13c   :  { %v412_v5 = vadd.f32 %v411_v39, %v372_v60 }
 0x13d   :  { %v393_v26 = vadd.f32 %v392_v27, %v375_v2 }
 0x13e   :  { %v413_v19 = vadd.f32 %v412_v5, %v374_v56 }
 0x13f   :  { %v394_v0 = vadd.f32 %v393_v26, %v377_v33 }
 0x140   :  { %v414_v8 = vadd.f32 %v413_v19, %v376_v63  ;;  %v271_v63 = vld [vmem:[%s2222_s3] sm:$0x3] }
 0x141   :  { %v395_v7 = vadd.f32 %v394_v0, %v379_v38 }
 0x142   :  { %v415_v14 = vadd.f32 %v414_v8, %v378_v59 }
 0x143   :  { %v396_v62 = vrot.slane %v395_v7, 4 }
 0x144   :  { %v416_v2 = vadd.f32 %v415_v14, %v380_v24 }
 0x145   :  { %v397_v49 = vadd.f32 %v396_v62, %v395_v7  ;;  %v433_v7 = vunpack.c.l.s4 %v1477_v51 }
 0x146   :  { %v417_v31 = vrot.slane %v416_v2, 4 }
 0x147   :  { %v398_v50 = vrot.slane %v397_v49, 2  ;;  %v434_v60 = vunpack.c.0.s8 %v433_v7 }
 0x148   :  { %v418_v29 = vadd.f32 %v417_v31, %v416_v2 }
 0x149   :  { %v399_v6 = vadd.f32 %v398_v50, %v397_v49  ;;  %v437_v62 = vsub.s32 %v434_v60, %v1579_v25  ;;  %v272_v50 = vld [vmem:[%s2223_s4] sm:$0x3] }
 0x14a   :  { %v419_v3 = vrot.slane %v418_v29, 2  ;;  %v1934_v25 = vrot.slane %v272_v50, %v1582_v30  ;;  %v1937_v24 = vrot.slane %v272_v50, %v1588_v35 }
 0x14b   :  { %v400_v27 = vrot.slane %v399_v6, 1 }
 0x14c   :  { %v420_v33 = vadd.f32 %v419_v3, %v418_v29 }
 0x14d   :  { %v401_v18 = vadd.f32 %v400_v27, %v399_v6 }
 0x14e   :  { %v421_v43 = vrot.slane %v420_v33, 1 }
 0x14f   :  { %v423_v26 = vmul.f32 0.0078125, %v401_v18 }
 0x150   :  { %v422_v34 = vadd.f32 %v421_v43, %v420_v33 }
 0x151   :  { %v425_v38 = vadd.f32 1e-05, %v423_v26 }
 0x152   :  { %v424_v0 = vmul.f32 0.0078125, %v422_v34 }
 0x153   :  { %1413 = vrsqrt.f32 %v425_v38 }
 0x154   :  { %v426_v32 = vadd.f32 1e-05, %v424_v0 }
 0x156   :  { %1415 = vrsqrt.f32 %v426_v32 }
 0x160   :  { %v1414_v39 = vpop.eup %1413 }
 0x163   :  { %v1416_v56 = vpop.eup %1415 }
 0x164   :  { %v431_v5 = vcombine.low %v1414_v39, %v1416_v56 }
 0x166   :  { %v438_v49 = vrot.slane %v431_v5, %v437_v62 }
 0x168   :  { %v445_v19 = vrot.slane %v438_v49, %v437_v62 }
 0x16a   :  { %v447_v59 = vmul.f32 %v445_v19, %v271_v63 }
 0x16c   :  { %v1928_v8 = vrot.slane %v447_v59, %v1582_v30  ;;  %v1931_v6 = vrot.slane %v447_v59, %v1588_v35 }
 0x16e   :  { %v460_v14 = vmul.f32 %v1931_v6, %v1762_v53  ;;  %v462_v2 = vmul.f32 %v1931_v6, %v1766_v58  ;;  %v459_v27 = vmul.f32 %v1928_v8, %v1728_v47  ;;  %v461_v31 = vmul.f32 %v1928_v8, %v1732_v41 }
 0x16f   :  { %v464_v29 = vmul.f32 %v1931_v6, %v1782_v45  ;;  %v466_v18 = vmul.f32 %v1931_v6, %v1796_v23  ;;  %v463_v58 = vmul.f32 %v1928_v8, %v1736_v54  ;;  %v465_v45 = vmul.f32 %v1928_v8, %v1744_v44 }
 0x170   :  { %v503_v35 = vadd.f32 %v1937_v24, %v460_v14  ;;  %v505_v3 = vadd.f32 %v1937_v24, %v462_v2  ;;  %v502_v53 = vadd.f32 %v1934_v25, %v459_v27  ;;  %v504_v47 = vadd.f32 %v1934_v25, %v461_v31 }
 0x171   :  { %v507_v33 = vadd.f32 %v1937_v24, %v464_v29  ;;  %v509_v41 = vadd.f32 %v1937_v24, %v466_v18  ;;  %v468_v51 = vmul.f32 %v1931_v6, %v1806_v20  ;;  %v470_v54 = vmul.f32 %v1931_v6, %v1818_v36 }
 0x172   :  { %v535_v26 = vmax.f32 %v503_v35, 0.0  ;;  %v537_v23 = vmax.f32 %v505_v3, 0.0  ;;  %v534_v43 = vmax.f32 %v502_v53, 0.0  ;;  %v536_v34 = vmax.f32 %v504_v47, 0.0 }
 0x173   :  { %v539_v38 = vmax.f32 %v507_v33, 0.0  ;;  %v541_v0 = vmax.f32 %v509_v41, 0.0  ;;  %v506_v60 = vadd.f32 %v1934_v25, %v463_v58  ;;  %v508_v39 = vadd.f32 %v1934_v25, %v465_v45 }
 0x174   :  { %v567_v32 = vpack.c.bf16 %v537_v23, %v535_v26  ;;  %v566_v7 = vpack.c.bf16 %v536_v34, %v534_v43  ;;  %v511_v62 = vadd.f32 %v1937_v24, %v468_v51  ;;  %v513_v56 = vadd.f32 %v1937_v24, %v470_v54 }
 0x175   :  { %v569_v44 = vpack.c.bf16 %v541_v0, %v539_v38  ;;  %v538_v5 = vmax.f32 %v506_v60, 0.0  ;;  %v540_v49 = vmax.f32 %v508_v39, 0.0  ;;  %v467_v20 = vmul.f32 %v1928_v8, %v1748_v42 }
 0x176   :  { %749 = vmatprep.mubr.bf16.mxu1 %v567_v32  ;;  %v469_v36 = vmul.f32 %v1928_v8, %v1756_v4  ;;  %v543_v63 = vmax.f32 %v511_v62, 0.0  ;;  %v545_v19 = vmax.f32 %v513_v56, 0.0  ;;  %v472_v50 = vmul.f32 %v1931_v6, %v1830_v55 }
 0x177   :  { %750 = vmatmul.mubr.bf16.vlgmr.msra.gmra.mxu1 %v566_v7  ;;  %v474_v59 = vmul.f32 %v1931_v6, %v1842_v46  ;;  %v568_v14 = vpack.c.bf16 %v540_v49, %v538_v5  ;;  %v510_v2 = vadd.f32 %v1934_v25, %v467_v20  ;;  %v471_v55 = vmul.f32 %v1928_v8, %v1770_v10 }
 0x178   :  { %757 = vmatprep.mubr.bf16.mxu1 %v569_v44  ;;  %v512_v27 = vadd.f32 %v1934_v25, %v469_v36  ;;  %v571_v31 = vpack.c.bf16 %v545_v19, %v543_v63  ;;  %v515_v29 = vadd.f32 %v1937_v24, %v472_v50  ;;  %v473_v46 = vmul.f32 %v1928_v8, %v1776_v15 }
 0x179   :  { %v517_v42 = vadd.f32 %v1937_v24, %v474_v59  ;;  %v542_v4 = vmax.f32 %v510_v2, 0.0  ;;  %v476_v53 = vmul.f32 %v1931_v6, %v1854_v11  ;;  %v478_v58 = vmul.f32 %v1931_v6, %v1866_v17 }
 0x17a   :  { %v544_v18 = vmax.f32 %v512_v27, 0.0  ;;  %v547_v35 = vmax.f32 %v515_v29, 0.0  ;;  %v514_v33 = vadd.f32 %v1934_v25, %v471_v55  ;;  %v516_v41 = vadd.f32 %v1934_v25, %v473_v46 }
 0x17b   :  { %v549_v3 = vmax.f32 %v517_v42, 0.0  ;;  %v519_v26 = vadd.f32 %v1937_v24, %v476_v53  ;;  %v521_v10 = vadd.f32 %v1937_v24, %v478_v58  ;;  %v475_v11 = vmul.f32 %v1928_v8, %v1790_v21 }
 0x17c   :  { %v570_v47 = vpack.c.bf16 %v544_v18, %v542_v4  ;;  %v546_v15 = vmax.f32 %v514_v33, 0.0  ;;  %v548_v23 = vmax.f32 %v516_v41, 0.0  ;;  %v477_v17 = vmul.f32 %v1928_v8, %v1800_v52 }
 0x17d   :  { %v573_v45 = vpack.c.bf16 %v549_v3, %v547_v35  ;;  %v551_v43 = vmax.f32 %v519_v26, 0.0  ;;  %v553_v34 = vmax.f32 %v521_v10, 0.0  ;;  %v480_v38 = vmul.f32 %v1931_v6, %v1878_v28 }
 0x17e   :  { %v482_v0 = vmul.f32 %v1931_v6, %v1886_v12  ;;  %v572_v32 = vpack.c.bf16 %v548_v23, %v546_v15  ;;  %v518_v51 = vadd.f32 %v1934_v25, %v475_v11  ;;  %v520_v54 = vadd.f32 %v1934_v25, %v477_v17 }
 0x17f   :  { %758 = vmatmul.mubr.bf16.gmra.mxu1 %v568_v14  ;;  %v575_v7 = vpack.c.bf16 %v553_v34, %v551_v43  ;;  %v523_v60 = vadd.f32 %v1937_v24, %v480_v38  ;;  %v479_v28 = vmul.f32 %v1928_v8, %v1812_v57  ;;  %v481_v12 = vmul.f32 %v1928_v8, %v1824_v40 }
 0x180   :  { %765 = vmatprep.mubr.bf16.mxu1 %v571_v31  ;;  %v525_v21 = vadd.f32 %v1937_v24, %v482_v0  ;;  %v550_v52 = vmax.f32 %v518_v51, 0.0  ;;  %v552_v39 = vmax.f32 %v520_v54, 0.0  ;;  %v484_v56 = vmul.f32 %v1931_v6, %v1894_v37  ;;  %v1406_v0 = vld [vmem:[%s2228_s9 + $0x30] sm:$0xff]  }
 0x181   :  { %v555_v44 = vmax.f32 %v523_v60, 0.0  ;;  %v486_v5 = vmul.f32 %v1931_v6, %v1900_v48  ;;  %v522_v20 = vadd.f32 %v1934_v25, %v479_v28  ;;  %v524_v36 = vadd.f32 %v1934_v25, %v481_v12  ;;  %v2050_v28 = vld [vmem:[%s2225_s6] ss:$0 sm:$0xff] }
 0x182   :  { %v557_v62 = vmax.f32 %v525_v21, 0.0  ;;  %v574_v49 = vpack.c.bf16 %v552_v39, %v550_v52  ;;  %v527_v19 = vadd.f32 %v1937_v24, %v484_v56  ;;  %v483_v37 = vmul.f32 %v1928_v8, %v1836_v61 }
 0x183   :  { %v529_v57 = vadd.f32 %v1937_v24, %v486_v5  ;;  %v554_v40 = vmax.f32 %v522_v20, 0.0  ;;  %v556_v50 = vmax.f32 %v524_v36, 0.0  ;;  %v485_v48 = vmul.f32 %v1928_v8, %v1848_v9 }
 0x184   :  { %v577_v63 = vpack.c.bf16 %v557_v62, %v555_v44  ;;  %v490_v59 = vmul.f32 %v1931_v6, %v1912_v1  ;;  %v559_v14 = vmax.f32 %v527_v19, 0.0  ;;  %v488_v27 = vmul.f32 %v1931_v6, %v1906_v13  ;;  %v1409_v44 = vld [vmem:[%s2228_s9 + $0x18] sm:$0xff]   ;;  %v1410_v19 = vld [vmem:[%s2228_s9 + $0x10] sm:$0xff]  }
 0x185   :  { %v561_v2 = vmax.f32 %v529_v57, 0.0  ;;  %v576_v31 = vpack.c.bf16 %v556_v50, %v554_v40  ;;  %v526_v29 = vadd.f32 %v1934_v25, %v483_v37  ;;  %v528_v42 = vadd.f32 %v1934_v25, %v485_v48 }
 0x186   :  { %v531_v18 = vadd.f32 %v1937_v24, %v488_v27  ;;  %v533_v61 = vadd.f32 %v1937_v24, %v490_v59  ;;  %v487_v1 = vmul.f32 %v1928_v8, %v1860_v16  ;;  %v489_v13 = vmul.f32 %v1928_v8, %v1872_v22  ;;  %v1411_v27 = vld [vmem:[%s2228_s9 + $0x8] sm:$0xff]  }
 0x187   :  { %766 = vmatmul.mubr.bf16.gmra.mxu1 %v570_v47  ;;  %v579_v4 = vpack.c.bf16 %v561_v2, %v559_v14  ;;  %v558_v9 = vmax.f32 %v526_v29, 0.0  ;;  %v560_v55 = vmax.f32 %v528_v42, 0.0 }
 0x188   :  { %773 = vmatprep.mubr.bf16.mxu1 %v573_v45  ;;  %v563_v6 = vmax.f32 %v531_v18, 0.0  ;;  %v565_v46 = vmax.f32 %v533_v61, 0.0  ;;  %v530_v3 = vadd.f32 %v1934_v25, %v487_v1  ;;  %v532_v53 = vadd.f32 %v1934_v25, %v489_v13  ;;  %v1405_v25 = vld [vmem:[%s2228_s9 + $0x38] sm:$0xff]   ;;  %v1412_v1 = vld [vmem:[%s2228_s9] sm:$0xff]  }
 0x189   :  { %v578_v35 = vpack.c.bf16 %v560_v55, %v558_v9  ;;  %1341 = vmatprep.subr.bf16.mxu0 %v1405_v25 }
 0x18a   :  { %v581_v58 = vpack.c.bf16 %v565_v46, %v563_v6  ;;  %v562_v24 = vmax.f32 %v530_v3, 0.0  ;;  %v564_v47 = vmax.f32 %v532_v53, 0.0  ;;  %1342 = vmatpush3.bf16.msra.mxu0 %v1405_v25 }
 0x18b   :  { %1343 = vmatprep.subr.bf16.mxu0 %v1406_v0 }
 0x18c   :  { %v580_v33 = vpack.c.bf16 %v564_v47, %v562_v24 }
 0x18e   :  { %1344 = vmatpush3.bf16.msra.mxu0 %v1406_v0 }
 0x18f   :  { %774 = vmatmul.mubr.bf16.gmra.mxu1 %v572_v32  ;;  %v1407_v32 = vld [vmem:[%s2228_s9 + $0x28] sm:$0xff]  }
 0x190   :  { %781 = vmatprep.mubr.bf16.mxu1 %v575_v7  ;;  %1345 = vmatprep.subr.bf16.mxu0 %v1407_v32  ;;  %v1408_v7 = vld [vmem:[%s2228_s9 + $0x20] sm:$0xff]  }
 0x192   :  { %1346 = vmatpush3.bf16.msra.mxu0 %v1407_v32 }
 0x193   :  { %1347 = vmatprep.subr.bf16.mxu0 %v1408_v7 }
 0x196   :  { %1348 = vmatpush3.bf16.msra.mxu0 %v1408_v7 }
 0x197   :  { %782 = vmatmul.mubr.bf16.gmra.mxu1 %v574_v49  ;;  %1349 = vmatprep.subr.bf16.mxu0 %v1409_v44 }
 0x198   :  { %789 = vmatprep.mubr.bf16.mxu1 %v577_v63 }
 0x19a   :  { %1350 = vmatpush3.bf16.msra.mxu0 %v1409_v44 }
 0x19b   :  { %1351 = vmatprep.subr.bf16.mxu0 %v1410_v19 }
 0x19e   :  { %1352 = vmatpush3.bf16.msra.mxu0 %v1410_v19 }
 0x19f   :  { %790 = vmatmul.mubr.bf16.gmra.mxu1 %v576_v31  ;;  %1353 = vmatprep.subr.bf16.mxu0 %v1411_v27 }
 0x1a0   :  { %797 = vmatprep.mubr.bf16.mxu1 %v579_v4 }
 0x1a2   :  { %1354 = vmatpush3.bf16.msra.mxu0 %v1411_v27 }
 0x1a3   :  { %1355 = vmatprep.subr.bf16.mxu0 %v1412_v1 }
 0x1a6   :  { %1356 = vmatpush3.bf16.msra.mxu0 %v1412_v1 }
 0x1a7   :  { %798 = vmatmul.mubr.bf16.gmra.mxu1 %v578_v35 }
 0x1a8   :  { %805 = vmatprep.mubr.bf16.mxu1 %v581_v58 }
 0x1af   :  { %806 = vmatmul.mubr.bf16.gmra.mxu1 %v580_v33 }
 0x237   :  { %v1277_v41 = vpop.f32.mrf.mxu1 }
 0x239   :  { %v1278_v45 = vpop.f32.mrf.mxu1 }
 0x23a   :  { %v1279_v52 = vadd.f32 %v1278_v45, %v1277_v41 }
 0x23b   :  { %v1280_v16 = vpop.f32.mrf.mxu1 }
 0x23c   :  { %v2059_v49 = vadd.f32 %v1279_v52, %v2050_v28 }
 0x23d   :  { %v1281_v26 = vpop.f32.mrf.mxu1 }
 0x23e   :  { %v1282_v60 = vadd.f32 %v1281_v26, %v1280_v16 }
 0x23f   :  { %v1283_v10 = vpop.f32.mrf.mxu1 }
 0x240   :  { %v2056_v62 = vadd.f32 %v1282_v60, %v2050_v28 }
 0x241   :  { %v1284_v22 = vpop.f32.mrf.mxu1 }
 0x242   :  { %v1285_v39 = vadd.f32 %v1284_v22, %v1283_v10  ;;  %v816_v57 = vadd.f32 %v2056_v62, %v2059_v49 }
 0x243   :  { %v1286_v8 = vpop.f32.mrf.mxu1 }
 0x244   :  { %v2062_v20 = vadd.f32 %v1285_v39, %v2050_v28 }
 0x245   :  { %v1287_v15 = vpop.f32.mrf.mxu1 }
 0x246   :  { %v1288_v56 = vadd.f32 %v1287_v15, %v1286_v8  ;;  %v817_v48 = vadd.f32 %v816_v57, %v2062_v20 }
 0x247   :  { %v1289_v23 = vpop.f32.mrf.mxu1 }
 0x248   :  { %v2070_v40 = vadd.f32 %v1288_v56, %v2050_v28 }
 0x249   :  { %v1290_v11 = vpop.f32.mrf.mxu1 }
 0x24a   :  { %v1291_v36 = vadd.f32 %v1290_v11, %v1289_v23  ;;  %v818_v31 = vadd.f32 %v817_v48, %v2070_v40 }
 0x24b   :  { %v1292_v17 = vpop.f32.mrf.mxu1 }
 0x24c   :  { %v2074_v59 = vadd.f32 %v1291_v36, %v2050_v28 }
 0x24d   :  { %v1293_v43 = vpop.f32.mrf.mxu1 }
 0x24e   :  { %v1294_v50 = vadd.f32 %v1293_v43, %v1292_v17  ;;  %v819_v18 = vadd.f32 %v818_v31, %v2074_v59 }
 0x24f   :  { %v1295_v34 = vpop.f32.mrf.mxu1 }
 0x250   :  { %v2081_v29 = vadd.f32 %v1294_v50, %v2050_v28 }
 0x251   :  { %v1296_v38 = vpop.f32.mrf.mxu1 }
 0x252   :  { %v1297_v14 = vadd.f32 %v1296_v38, %v1295_v34  ;;  %v820_v13 = vadd.f32 %v819_v18, %v2081_v29 }
 0x253   :  { %v1298_v51 = vpop.f32.mrf.mxu1 }
 0x254   :  { %v2085_v61 = vadd.f32 %v1297_v14, %v2050_v28 }
 0x255   :  { %v1299_v54 = vpop.f32.mrf.mxu1 }
 0x256   :  { %v1300_v42 = vadd.f32 %v1299_v54, %v1298_v51  ;;  %v821_v3 = vadd.f32 %v820_v13, %v2085_v61 }
 0x257   :  { %v1301_v21 = vpop.f32.mrf.mxu1 }
 0x258   :  { %v779_v6 = vadd.f32 %v1300_v42, %v2050_v28 }
 0x259   :  { %v1302_v12 = vpop.f32.mrf.mxu1 }
 0x25a   :  { %v1303_v9 = vadd.f32 %v1302_v12, %v1301_v21  ;;  %v822_v47 = vadd.f32 %v821_v3, %v779_v6 }
 0x25b   :  { %v1304_v5 = vpop.f32.mrf.mxu1 }
 0x25c   :  { %v784_v53 = vadd.f32 %v1303_v9, %v2050_v28 }
 0x25d   :  { %v1305_v63 = vpop.f32.mrf.mxu1 }
 0x25e   :  { %v1306_v46 = vadd.f32 %v1305_v63, %v1304_v5  ;;  %v823_v16 = vadd.f32 %v822_v47, %v784_v53 }
 0x25f   :  { %v1307_v37 = vpop.f32.mrf.mxu1 }
 0x260   :  { %v787_v33 = vadd.f32 %v1306_v46, %v2050_v28 }
 0x261   :  { %v1308_v2 = vpop.f32.mrf.mxu1 }
 0x262   :  { %v1309_v58 = vadd.f32 %v1308_v2, %v1307_v37  ;;  %v824_v8 = vadd.f32 %v823_v16, %v787_v33 }
 0x263   :  { %v1310_v4 = vpop.f32.mrf.mxu1 }
 0x264   :  { %v792_v26 = vadd.f32 %v1309_v58, %v2050_v28 }
 0x265   :  { %v1311_v55 = vpop.f32.mrf.mxu1 }
 0x266   :  { %v1312_v41 = vadd.f32 %v1311_v55, %v1310_v4  ;;  %v825_v17 = vadd.f32 %v824_v8, %v792_v26 }
 0x267   :  { %v1313_v35 = vpop.f32.mrf.mxu1 }
 0x268   :  { %v795_v15 = vadd.f32 %v1312_v41, %v2050_v28 }
 0x269   :  { %v1314_v24 = vpop.f32.mrf.mxu1 }
 0x26a   :  { %v1315_v10 = vadd.f32 %v1314_v24, %v1313_v35  ;;  %v826_v34 = vadd.f32 %v825_v17, %v795_v15 }
 0x26b   :  { %v1316_v45 = vpop.f32.mrf.mxu1 }
 0x26c   :  { %v800_v43 = vadd.f32 %v1315_v10, %v2050_v28 }
 0x26d   :  { %v1317_v22 = vpop.f32.mrf.mxu1 }
 0x26e   :  { %v1318_v23 = vadd.f32 %v1317_v22, %v1316_v45  ;;  %v827_v51 = vadd.f32 %v826_v34, %v800_v43 }
 0x26f   :  { %v1319_v11 = vpop.f32.mrf.mxu1 }
 0x270   :  { %v803_v38 = vadd.f32 %v1318_v23, %v2050_v28 }
 0x271   :  { %v1320_v25 = vpop.f32.mrf.mxu1 }
 0x272   :  { %v1321_v0 = vadd.f32 %v1320_v25, %v1319_v11  ;;  %v828_v60 = vadd.f32 %v827_v51, %v803_v38 }
 0x273   :  { %v1322_v32 = vpop.f32.mrf.mxu1 }
 0x274   :  { %v808_v54 = vadd.f32 %v1321_v0, %v2050_v28 }
 0x275   :  { %v1323_v7 = vpop.f32.mrf.mxu1 }
 0x276   :  { %v1324_v21 = vadd.f32 %v1323_v7, %v1322_v32  ;;  %v829_v52 = vadd.f32 %v828_v60, %v808_v54 }
 0x278   :  { %v811_v39 = vadd.f32 %v1324_v21, %v2050_v28 }
 0x27a   :  { %v830_v12 = vadd.f32 %v829_v52, %v811_v39 }
 0x27c   :  { %v831_v44 = vrot.slane %v830_v12, 4 }
 0x27e   :  { %v832_v56 = vadd.f32 %v831_v44, %v830_v12  ;;  %v814_v12 = vld [vmem:[%s2226_s7] sm:$0x1] }
 0x280   :  { %v833_v5 = vrot.slane %v832_v56, 2 }
 0x282   :  { %v834_v36 = vadd.f32 %v833_v5, %v832_v56 }
 0x284   :  { %v835_v63 = vrot.slane %v834_v36, 1 }
 0x286   :  { %v836_v19 = vadd.f32 %v835_v63, %v834_v36  ;;  %v1251_v36 = vld [vmem:[%s2227_s8] ss:$0 sm:$0xff] }
 0x288   :  { %v837_v57 = vmul.f32 0.0078125, %v836_v19 }
 0x28a   :  { %v838_v50 = vsub.f32 %v2059_v49, %v837_v57  ;;  %v839_v37 = vsub.f32 %v2056_v62, %v837_v57  ;;  %v840_v48 = vsub.f32 %v2062_v20, %v837_v57  ;;  %v841_v27 = vsub.f32 %v2070_v40, %v837_v57 }
 0x28b   :  { %v842_v28 = vsub.f32 %v2074_v59, %v837_v57  ;;  %v843_v4 = vsub.f32 %v2081_v29, %v837_v57  ;;  %v844_v55 = vsub.f32 %v2085_v61, %v837_v57  ;;  %v845_v13 = vsub.f32 %v779_v6, %v837_v57 }
 0x28c   :  { %v854_v14 = vmul.f32 %v838_v50, %v838_v50  ;;  %v855_v2 = vmul.f32 %v839_v37, %v839_v37  ;;  %v856_v31 = vmul.f32 %v840_v48, %v840_v48  ;;  %v857_v18 = vmul.f32 %v841_v27, %v841_v27 }
 0x28d   :  { %v858_v1 = vmul.f32 %v842_v28, %v842_v28  ;;  %v859_v62 = vmul.f32 %v843_v4, %v843_v4  ;;  %v2108_v20 = vsub.f32 %v784_v53, %v837_v57  ;;  %v860_v35 = vmul.f32 %v844_v55, %v844_v55 }
 0x28e   :  { %v870_v42 = vadd.f32 %v855_v2, %v854_v14  ;;  %v847_v40 = vsub.f32 %v787_v33, %v837_v57  ;;  %v861_v58 = vmul.f32 %v845_v13, %v845_v13  ;;  %v2110_v24 = vsub.f32 %v792_v26, %v837_v57 }
 0x28f   :  { %v862_v29 = vmul.f32 %v2108_v20, %v2108_v20  ;;  %v2114_v41 = vsub.f32 %v795_v15, %v837_v57  ;;  %v2116_v6 = vsub.f32 %v800_v43, %v837_v57  ;;  %v2120_v10 = vsub.f32 %v803_v38, %v837_v57 }
 0x290   :  { %v871_v9 = vadd.f32 %v870_v42, %v856_v31  ;;  %v863_v61 = vmul.f32 %v847_v40, %v847_v40  ;;  %v864_v53 = vmul.f32 %v2110_v24, %v2110_v24  ;;  %v2124_v22 = vsub.f32 %v808_v54, %v837_v57 }
 0x291   :  { %v865_v33 = vmul.f32 %v2114_v41, %v2114_v41  ;;  %v866_v8 = vmul.f32 %v2116_v6, %v2116_v6  ;;  %v2128_v23 = vsub.f32 %v811_v39, %v837_v57  ;;  %v867_v11 = vmul.f32 %v2120_v10, %v2120_v10 }
 0x292   :  { %v872_v49 = vadd.f32 %v871_v9, %v857_v18  ;;  %v868_v43 = vmul.f32 %v2124_v22, %v2124_v22 }
 0x293   :  { %v869_v34 = vmul.f32 %v2128_v23, %v2128_v23 }
 0x294   :  { %v873_v46 = vadd.f32 %v872_v49, %v858_v1 }
 0x296   :  { %v874_v3 = vadd.f32 %v873_v46, %v859_v62 }
 0x298   :  { %v875_v59 = vadd.f32 %v874_v3, %v860_v35 }
 0x29a   :  { %v876_v47 = vadd.f32 %v875_v59, %v861_v58 }
 0x29c   :  { %v877_v45 = vadd.f32 %v876_v47, %v862_v29 }
 0x29e   :  { %v878_v16 = vadd.f32 %v877_v45, %v863_v61 }
 0x2a0   :  { %v879_v26 = vadd.f32 %v878_v16, %v864_v53 }
 0x2a2   :  { %v880_v15 = vadd.f32 %v879_v26, %v865_v33 }
 0x2a4   :  { %v881_v17 = vadd.f32 %v880_v15, %v866_v8 }
 0x2a6   :  { %v882_v25 = vadd.f32 %v881_v17, %v867_v11 }
 0x2a8   :  { %v883_v38 = vadd.f32 %v882_v25, %v868_v43 }
 0x2aa   :  { %v884_v0 = vadd.f32 %v883_v38, %v869_v34 }
 0x2ac   :  { %v885_v32 = vrot.slane %v884_v0, 4 }
 0x2ae   :  { %v886_v51 = vadd.f32 %v885_v32, %v884_v0 }
 0x2b0   :  { %v887_v54 = vrot.slane %v886_v51, 2 }
 0x2b2   :  { %v888_v7 = vadd.f32 %v887_v54, %v886_v51 }
 0x2b4   :  { %v889_v60 = vrot.slane %v888_v7, 1 }
 0x2b6   :  { %v890_v21 = vadd.f32 %v889_v60, %v888_v7 }
 0x2b8   :  { %v891_v52 = vmul.f32 0.0078125, %v890_v21 }
 0x2ba   :  { %v892_v39 = vadd.f32 1e-05, %v891_v52 }
 0x2bc   :  { %1417 = vrsqrt.f32 %v892_v39 }
 0x2c9   :  { %v1418_v44 = vpop.eup %1417 }
 0x2ca   :  { %v894_v56 = vmul.f32 %v1418_v44, %v814_v12 }
 0x2cc   :  { %v899_v5 = vrot.slane %v894_v56, %v1582_v30 }
 0x2ce   :  { %v901_v63 = vmul.f32 %v899_v5, %v838_v50  ;;  %v902_v19 = vmul.f32 %v899_v5, %v839_v37  ;;  %v903_v57 = vmul.f32 %v899_v5, %v840_v48  ;;  %v904_v14 = vmul.f32 %v899_v5, %v841_v27 }
 0x2cf   :  { %v905_v2 = vmul.f32 %v899_v5, %v842_v28  ;;  %v906_v31 = vmul.f32 %v899_v5, %v843_v4  ;;  %v907_v1 = vmul.f32 %v899_v5, %v844_v55  ;;  %v908_v35 = vmul.f32 %v899_v5, %v845_v13 }
 0x2d0   :  { %v923_v42 = vadd.f32 %v1251_v36, %v901_v63  ;;  %v924_v18 = vadd.f32 %v1251_v36, %v902_v19  ;;  %v925_v9 = vadd.f32 %v1251_v36, %v903_v57  ;;  %v926_v49 = vadd.f32 %v1251_v36, %v904_v14 }
 0x2d1   :  { %v927_v62 = vadd.f32 %v1251_v36, %v905_v2  ;;  %v928_v46 = vadd.f32 %v1251_v36, %v906_v31  ;;  %v909_v37 = vmul.f32 %v899_v5, %v2108_v20  ;;  %v910_v48 = vmul.f32 %v899_v5, %v847_v40 }
 0x2d2   :  { %v939_v3 = vmax.f32 %v923_v42, 0.0  ;;  %v940_v30 = vmax.f32 %v924_v18, 0.0  ;;  %v941_v58 = vmax.f32 %v925_v9, 0.0  ;;  %v942_v59 = vmax.f32 %v926_v49, 0.0 }
 0x2d3   :  { %v943_v29 = vmax.f32 %v927_v62, 0.0  ;;  %v944_v47 = vmax.f32 %v928_v46, 0.0  ;;  %v929_v28 = vadd.f32 %v1251_v36, %v907_v1  ;;  %v930_v4 = vadd.f32 %v1251_v36, %v908_v35 }
 0x2d4   :  { %v955_v50 = vpack.c.bf16 %v940_v30, %v939_v3  ;;  %v956_v27 = vpack.c.bf16 %v942_v59, %v941_v58  ;;  %v931_v55 = vadd.f32 %v1251_v36, %v909_v37  ;;  %v932_v45 = vadd.f32 %v1251_v36, %v910_v48 }
 0x2d5   :  { %v957_v61 = vpack.c.bf16 %v944_v47, %v943_v29  ;;  %v945_v13 = vmax.f32 %v929_v28, 0.0  ;;  %v946_v53 = vmax.f32 %v930_v4, 0.0  ;;  %v911_v16 = vmul.f32 %v899_v5, %v2110_v24 }
 0x2d6   :  { %1357 = vmatprep.mubr.bf16.mxu0 %v955_v50  ;;  %v912_v33 = vmul.f32 %v899_v5, %v2114_v41  ;;  %v947_v26 = vmax.f32 %v931_v55, 0.0  ;;  %v948_v8 = vmax.f32 %v932_v45, 0.0  ;;  %v913_v20 = vmul.f32 %v899_v5, %v2116_v6 }
 0x2d7   :  { %1358 = vmatmul.mubr.bf16.vlgmr.msra.gmra.mxu0 %v956_v27  ;;  %v914_v40 = vmul.f32 %v899_v5, %v2120_v10  ;;  %v958_v15 = vpack.c.bf16 %v946_v53, %v945_v13  ;;  %v933_v11 = vadd.f32 %v1251_v36, %v911_v16  ;;  %v916_v38 = vmul.f32 %v899_v5, %v2128_v23  ;;  %v2153_v23 = vld [vmem:[%s2229_s10] ss:$0 sm:$0xff] }
 0x2d8   :  { %1361 = vmatprep.mubr.bf16.mxu0 %v957_v61  ;;  %v934_v17 = vadd.f32 %v1251_v36, %v912_v33  ;;  %v959_v43 = vpack.c.bf16 %v948_v8, %v947_v26  ;;  %v935_v25 = vadd.f32 %v1251_v36, %v913_v20  ;;  %v915_v41 = vmul.f32 %v899_v5, %v2124_v22 }
 0x2d9   :  { %v936_v34 = vadd.f32 %v1251_v36, %v914_v40  ;;  %v949_v0 = vmax.f32 %v933_v11, 0.0  ;;  %v938_v7 = vadd.f32 %v1251_v36, %v916_v38 }
 0x2da   :  { %v950_v24 = vmax.f32 %v934_v17, 0.0  ;;  %v951_v32 = vmax.f32 %v935_v25, 0.0  ;;  %v937_v6 = vadd.f32 %v1251_v36, %v915_v41 }
 0x2db   :  { %v952_v51 = vmax.f32 %v936_v34, 0.0  ;;  %v954_v21 = vmax.f32 %v938_v7, 0.0 }
 0x2dc   :  { %v960_v54 = vpack.c.bf16 %v950_v24, %v949_v0  ;;  %v953_v60 = vmax.f32 %v937_v6, 0.0 }
 0x2dd   :  { %v961_v10 = vpack.c.bf16 %v952_v51, %v951_v32 }
 0x2de   :  { %v962_v52 = vpack.c.bf16 %v954_v21, %v953_v60 }
 0x2df   :  { %1362 = vmatmul.mubr.bf16.gmra.mxu0 %v958_v15 }
 0x2e0   :  { %1365 = vmatprep.mubr.bf16.mxu0 %v959_v43 }
 0x2e7   :  { %1366 = vmatmul.mubr.bf16.gmra.mxu0 %v960_v54 }
 0x2e8   :  { %1369 = vmatprep.mubr.bf16.mxu0 %v961_v10 }
 0x2ef   :  { %1370 = vmatmul.mubr.bf16.gmra.mxu0 %v962_v52 }
 0x397   :  { %v1359_v39 = vpop.f32.mrf.mxu0 }
 0x398   :  { %v1077_v22 = vadd.f32 %v1359_v39, %v2153_v23 }
 0x399   :  { %v1068_v12 = vpop.f32.mrf.mxu0 }
 0x39a   :  { %v1133_v44 = vmul.f32 0.5, %v1077_v22  ;;  %v1069_v56 = vadd.f32 %v2153_v23, %v1068_v12 }
 0x39b   :  { %v1360_v5 = vpop.f32.mrf.mxu0 }
 0x39c   :  { %1419 = vtanh.f32 %v1133_v44  ;;  %v1131_v36 = vmul.f32 0.5, %v1069_v56  ;;  %v1080_v63 = vadd.f32 %v1360_v5, %v2153_v23 }
 0x39d   :  { %v1071_v19 = vpop.f32.mrf.mxu0 }
 0x39e   :  { %1421 = vtanh.f32 %v1131_v36  ;;  %v1134_v57 = vmul.f32 0.5, %v1080_v63  ;;  %v1072_v14 = vadd.f32 %v2153_v23, %v1071_v19 }
 0x39f   :  { %v1363_v2 = vpop.f32.mrf.mxu0 }
 0x3a0   :  { %1423 = vtanh.f32 %v1134_v57  ;;  %v1132_v31 = vmul.f32 0.5, %v1072_v14  ;;  %v1093_v42 = vadd.f32 %v1363_v2, %v2153_v23 }
 0x3a1   :  { %v1084_v18 = vpop.f32.mrf.mxu0 }
 0x3a2   :  { %1425 = vtanh.f32 %v1132_v31  ;;  %v1137_v9 = vmul.f32 0.5, %v1093_v42  ;;  %v1085_v1 = vadd.f32 %v2153_v23, %v1084_v18 }
 0x3a3   :  { %v1364_v49 = vpop.f32.mrf.mxu0 }
 0x3a4   :  { %1427 = vtanh.f32 %v1137_v9  ;;  %v1135_v62 = vmul.f32 0.5, %v1085_v1  ;;  %v1096_v46 = vadd.f32 %v1364_v49, %v2153_v23 }
 0x3a5   :  { %v1087_v35 = vpop.f32.mrf.mxu0 }
 0x3a6   :  { %1429 = vtanh.f32 %v1135_v62  ;;  %v1138_v3 = vmul.f32 0.5, %v1096_v46  ;;  %v1088_v30 = vadd.f32 %v2153_v23, %v1087_v35 }
 0x3a7   :  { %v1367_v58 = vpop.f32.mrf.mxu0 }
 0x3a8   :  { %1431 = vtanh.f32 %v1138_v3  ;;  %v1136_v59 = vmul.f32 0.5, %v1088_v30  ;;  %v1109_v29 = vadd.f32 %v1367_v58, %v2153_v23 }
 0x3a9   :  { %v1420_v47 = vpop.eup %1419  ;;  %v1100_v50 = vpop.f32.mrf.mxu0 }
 0x3aa   :  { %v1165_v37 = vmul.f32 0.5, %v1420_v47  ;;  %1433 = vtanh.f32 %v1136_v59  ;;  %v1141_v48 = vmul.f32 0.5, %v1109_v29  ;;  %v1101_v27 = vadd.f32 %v2153_v23, %v1100_v50 }
 0x3ab   :  { %v1422_v28 = vpop.eup %1421  ;;  %v1368_v4 = vpop.f32.mrf.mxu0 }
 0x3ac   :  { %v1181_v61 = vadd.f32 0.5, %v1165_v37  ;;  %v1163_v55 = vmul.f32 0.5, %v1422_v28  ;;  %1435 = vtanh.f32 %v1141_v48  ;;  %v1139_v45 = vmul.f32 0.5, %v1101_v27 }
 0x3ad   :  { %v1424_v13 = vpop.eup %1423  ;;  %v1112_v53 = vadd.f32 %v1368_v4, %v2153_v23  ;;  %v1103_v16 = vpop.f32.mrf.mxu0 }
 0x3ae   :  { %1197 = vst [vmem:[%s2230_s11 + $0x10] sm:$0xff] %v1181_v61  ;;  %v1179_v33 = vadd.f32 0.5, %v1163_v55  ;;  %v1166_v26 = vmul.f32 0.5, %v1424_v13  ;;  %1437 = vtanh.f32 %v1139_v45  ;;  %v1104_v8 = vadd.f32 %v2153_v23, %v1103_v16 }
 0x3af   :  { %v1426_v20 = vpop.eup %1425  ;;  %v1142_v40 = vmul.f32 0.5, %v1112_v53  ;;  %v1371_v15 = vpop.f32.mrf.mxu0 }
 0x3b0   :  { %1195 = vst [vmem:[%s2230_s11] sm:$0xff] %v1179_v33  ;;  %v1182_v11 = vadd.f32 0.5, %v1166_v26  ;;  %v1164_v17 = vmul.f32 0.5, %v1426_v20  ;;  %v1140_v43 = vmul.f32 0.5, %v1104_v8  ;;  %v1125_v25 = vadd.f32 %v1371_v15, %v2153_v23 }
 0x3b1   :  { %v1428_v34 = vpop.eup %1427  ;;  %1439 = vtanh.f32 %v1142_v40  ;;  %v1116_v38 = vpop.f32.mrf.mxu0 }
 0x3b2   :  { %1198 = vst [vmem:[%s2230_s11 + $0x18] sm:$0xff] %v1182_v11  ;;  %v1180_v0 = vadd.f32 0.5, %v1164_v17  ;;  %v1169_v24 = vmul.f32 0.5, %v1428_v34  ;;  %1441 = vtanh.f32 %v1140_v43  ;;  %v1145_v41 = vmul.f32 0.5, %v1125_v25 }
 0x3b3   :  { %v1430_v32 = vpop.eup %1429  ;;  %v1117_v51 = vadd.f32 %v2153_v23, %v1116_v38  ;;  %v1372_v54 = vpop.f32.mrf.mxu0 }
 0x3b4   :  { %1196 = vst [vmem:[%s2230_s11 + $0x8] sm:$0xff] %v1180_v0  ;;  %v1185_v6 = vadd.f32 0.5, %v1169_v24  ;;  %v1167_v7 = vmul.f32 0.5, %v1430_v32  ;;  %1443 = vtanh.f32 %v1145_v41  ;;  %v1128_v10 = vadd.f32 %v1372_v54, %v2153_v23 }
 0x3b5   :  { %v1432_v60 = vpop.eup %1431  ;;  %v1143_v21 = vmul.f32 0.5, %v1117_v51  ;;  %v1119_v52 = vpop.f32.mrf.mxu0 }
 0x3b6   :  { %1201 = vst [vmem:[%s2230_s11 + $0x30] sm:$0xff] %v1185_v6  ;;  %v1183_v39 = vadd.f32 0.5, %v1167_v7  ;;  %v1170_v22 = vmul.f32 0.5, %v1432_v60  ;;  %v1146_v12 = vmul.f32 0.5, %v1128_v10  ;;  %v1120_v44 = vadd.f32 %v2153_v23, %v1119_v52 }
 0x3b7   :  { %v1434_v56 = vpop.eup %1433  ;;  %1445 = vtanh.f32 %v1143_v21 }
 0x3b8   :  { %1199 = vst [vmem:[%s2230_s11 + $0x20] sm:$0xff] %v1183_v39  ;;  %v1186_v5 = vadd.f32 0.5, %v1170_v22  ;;  %v1168_v36 = vmul.f32 0.5, %v1434_v56  ;;  %1447 = vtanh.f32 %v1146_v12  ;;  %v1144_v63 = vmul.f32 0.5, %v1120_v44 }
 0x3b9   :  { %v1436_v19 = vpop.eup %1435 }
 0x3ba   :  { %1202 = vst [vmem:[%s2230_s11 + $0x38] sm:$0xff] %v1186_v5  ;;  %v1184_v57 = vadd.f32 0.5, %v1168_v36  ;;  %v1173_v14 = vmul.f32 0.5, %v1436_v19  ;;  %1449 = vtanh.f32 %v1144_v63 }
 0x3bb   :  { %v1438_v2 = vpop.eup %1437 }
 0x3bc   :  { %1200 = vst [vmem:[%s2230_s11 + $0x28] sm:$0xff] %v1184_v57  ;;  %v1189_v23 = vadd.f32 0.5, %v1173_v14  ;;  %v1171_v31 = vmul.f32 0.5, %v1438_v2 }
 0x3be   :  { %v1440_v42 = vpop.eup %1439  ;;  %1205 = vst [vmem:[%s2230_s11 + $0x50] sm:$0xff] %v1189_v23  ;;  %v1187_v18 = vadd.f32 0.5, %v1171_v31 }
 0x3bf   :  { %v1442_v9 = vpop.eup %1441  ;;  %v1174_v1 = vmul.f32 0.5, %v1440_v42 }
 0x3c0   :  { %1203 = vst [vmem:[%s2230_s11 + $0x40] sm:$0xff] %v1187_v18  ;;  %v1172_v49 = vmul.f32 0.5, %v1442_v9 }
 0x3c1   :  { %v1444_v62 = vpop.eup %1443  ;;  %v1190_v46 = vadd.f32 0.5, %v1174_v1 }
 0x3c2   :  { %v1188_v35 = vadd.f32 0.5, %v1172_v49  ;;  %v1177_v3 = vmul.f32 0.5, %v1444_v62 }
 0x3c3   :  { %1206 = vst [vmem:[%s2230_s11 + $0x58] sm:$0xff] %v1190_v46 }
 0x3c4   :  { %v1446_v30 = vpop.eup %1445  ;;  %1204 = vst [vmem:[%s2230_s11 + $0x48] sm:$0xff] %v1188_v35  ;;  %v1193_v58 = vadd.f32 0.5, %v1177_v3 }
 0x3c5   :  { %v1448_v59 = vpop.eup %1447  ;;  %v1175_v29 = vmul.f32 0.5, %v1446_v30 }
 0x3c6   :  { %1209 = vst [vmem:[%s2230_s11 + $0x70] sm:$0xff] %v1193_v58  ;;  %v1178_v47 = vmul.f32 0.5, %v1448_v59 }
 0x3c7   :  { %v1450_v50 = vpop.eup %1449  ;;  %v1191_v37 = vadd.f32 0.5, %v1175_v29 }
 0x3c8   :  { %v1194_v48 = vadd.f32 0.5, %v1178_v47  ;;  %v1176_v27 = vmul.f32 0.5, %v1450_v50 }
 0x3c9   :  { %1207 = vst [vmem:[%s2230_s11 + $0x60] sm:$0xff] %v1191_v37 }
 0x3ca   :  { %1210 = vst [vmem:[%s2230_s11 + $0x78] sm:$0xff] %v1194_v48  ;;  %v1192_v28 = vadd.f32 0.5, %v1176_v27 }
 0x3cc   :  { %1208 = vst [vmem:[%s2230_s11 + $0x68] sm:$0xff] %v1192_v28 }
 0x3cd   :  { %1215 = vsyncpa [#allocation3], 1 }

</bundles_post_ra>
